<compile_context>
chip_gen: v6e
topology: v6e:2x2x1
jax: 0.10.0
libtpu: 0.0.40
codegen_flags: <defaults>
</compile_context>

<pallas_src>
import functools

import jax
import jax.numpy as jnp
from jax.experimental import pallas as pl
from jax.experimental.pallas import tpu as pltpu

_LANES = 128
_SMALL_BYTES = 1 << 20  # below this, plain fused XLA is the right tool


def _cdiv(a, b):
    return -(-a // b)


def _round_up(x, m):
    return _cdiv(x, m) * m


def _round_down(x, m):
    return (x // m) * m


def _mem_params():
    """(per-buffer tile budget, vmem_limit_bytes), generation aware."""
    try:
        vmem = int(pltpu.get_tpu_info().vmem_capacity_bytes)
    except Exception:
        vmem = 64 * 1024 * 1024  # conservative (v7x-sized) fallback
    if vmem >= 128 * 1024 * 1024:
        # v5e / v6e: 128 MiB physical VMEM. 2 operands x 2 buffers x 8 MiB
        # = 32 MiB pipeline footprint, limit 64 MiB leaves headroom.
        return 8 * 1024 * 1024, 64 * 1024 * 1024
    # v7x: 64 MiB physical / 32 MiB scoped.  2 x 2 x 4 MiB = 16 MiB footprint.
    return 4 * 1024 * 1024, 32 * 1024 * 1024


def _plan(shape, in_dtype, out_dtype, tile_bytes):
    """Choose a zero-copy 2D view (rows, width) and its block tiling.

    Returns (rows, width, row_tile, width_tile, grid).  The reshape
    x.reshape(rows, width) is always row-major-preserving (a bitcast).
    Block dims are either multiples of the native (sublane, 128) tile or
    equal to the full array dims, so the BlockSpec is always legal; ragged
    edges rely on Pallas' masked boundary handling.
    """
    in_item = jnp.dtype(in_dtype).itemsize
    out_item = jnp.dtype(out_dtype).itemsize
    item = max(in_item, out_item)                    # VMEM budget per element
    sublane = max(8, 32 // min(in_item, out_item))   # native 2nd-minor multiple

    total = 1
    for d in shape:
        total *= int(d)

    # ---- logical 2D slab (rows, width) ----
    if total % _LANES == 0:
        # Lane-perfect flat slab.  Widen to 128*k when it divides evenly,
        # keeps a sublane strip within budget, and leaves rows splittable.
        t128 = total // _LANES
        k = 1
        for cand in (64, 32, 16, 8, 4, 2):
            if (t128 % cand == 0
                    and sublane * cand * _LANES * item <= tile_bytes
                    and t128 // cand >= 2 * sublane):
                k = cand
                break
        width = k * _LANES
        rows = total // width
    else:
        # Factor the original shape into (leading product, trailing product):
        # prefer the widest trailing product whose sublane strip fits the
        # budget while keeping rows splittable for the megacore.
        cands = []
        w = 1
        for d in reversed(shape):
            w *= int(d)
            cands.append((total // w, w))            # width increasing
        fit = [c for c in cands
               if sublane * _round_up(c[1], _LANES) * item <= tile_bytes]
        pref = [c for c in fit if c[0] >= 2 * sublane]
        if pref:
            rows, width = pref[-1]
        elif fit:
            rows, width = fit[-1]
        else:
            rows, width = 1, total                   # giant last dim: tile width

    # ---- width tiling ----
    if sublane * _round_up(width, _LANES) * item <= tile_bytes:
        width_tile = width                           # full-width blocks
    else:
        width_tile = max(_LANES,
                         _round_down(tile_bytes // (sublane * item), _LANES))
    w_blocks = _cdiv(width, width_tile)
    wt_vmem = _round_up(width_tile, _LANES)

    # ---- row tiling (largest sublane-aligned tile within the budget) ----
    max_rt = max(sublane, _round_down(tile_bytes // (wt_vmem * item), sublane))
    row_tile = min(rows, max_rt)
    r_blocks = _cdiv(rows, row_tile)

    # ---- megacore: at least 2 blocks, prefer an even count ----
    n = r_blocks * w_blocks
    want = 2 if n == 1 else (n + 1 if n % 2 else n)
    if want != n:
        if w_blocks == 1 and rows >= 2 * sublane:
            rt = min(max_rt,
                     max(sublane, _round_up(_cdiv(rows, want), sublane)))
            if _cdiv(rows, rt) >= 2:
                row_tile = rt
                r_blocks = _cdiv(rows, row_tile)
        elif r_blocks == 1 and w_blocks == 1 and width >= 2 * _LANES:
            width_tile = max(_LANES, _round_up(_cdiv(width, 2), _LANES))
            w_blocks = _cdiv(width, width_tile)

    return rows, width, row_tile, width_tile, (r_blocks, w_blocks)


def _rescale_kernel(x_ref, o_ref, *, scale, bias, compute_dtype):
    # Elementwise affine on the current VMEM block.  Upcast in-register so
    # bf16/fp16 inputs get a single rounding on store (VPU slack is huge).
    x = x_ref[...].astype(compute_dtype)
    o_ref[...] = (x * scale + bias).astype(o_ref.dtype)


def rescale_pallas(x, in_range, out_range, *, min_pallas_bytes=_SMALL_BYTES):
    """Apply Rescale(in_range, out_range) to x (any shape) via a Pallas kernel.

    in_range / out_range must be static Python numbers (they are baked into
    the kernel as immediates).  Floating inputs keep their dtype; integer /
    bool inputs return float32 (matching float-scalar promotion in torch).
    """
    assert in_range[0] < in_range[1]
    assert out_range[0] < out_range[1]
    scale = float(out_range[1] - out_range[0]) / float(in_range[1] - in_range[0])
    bias = float(out_range[0]) - scale * float(in_range[0])

    in_dtype = x.dtype
    if jnp.issubdtype(in_dtype, jnp.floating):
        out_dtype = in_dtype
        compute_dtype = jnp.promote_types(in_dtype, jnp.float32)
    else:
        out_dtype = jnp.dtype(jnp.float32)
        compute_dtype = jnp.dtype(jnp.float32)

    total = int(x.size)
    in_item = jnp.dtype(in_dtype).itemsize
    out_item = jnp.dtype(out_dtype).itemsize

    # Small / empty inputs: fused XLA elementwise is already at the HBM
    # roofline; skip the pallas_call fixed overhead and layout plumbing.
    if total == 0 or total * in_item < min_pallas_bytes:
        y = x.astype(compute_dtype) * scale + bias
        return y.astype(out_dtype)

    tile_bytes, vmem_limit = _mem_params()
    rows, width, row_tile, width_tile, grid = _plan(
        x.shape, in_dtype, out_dtype, tile_bytes)

    x2d = x.reshape(rows, width)  # row-major-preserving -> no copy

    kernel = functools.partial(
        _rescale_kernel, scale=scale, bias=bias, compute_dtype=compute_dtype)

    out2d = pl.pallas_call(
        kernel,
        out_shape=jax.ShapeDtypeStruct((rows, width), out_dtype),
        grid_spec=pltpu.PrefetchScalarGridSpec(
            num_scalar_prefetch=0,
            grid=grid,
            in_specs=[pl.BlockSpec((row_tile, width_tile), lambda i, j: (i, j))],
            out_specs=pl.BlockSpec((row_tile, width_tile), lambda i, j: (i, j)),
        ),
        compiler_params=pltpu.CompilerParams(
            dimension_semantics=("parallel", "parallel"),
            vmem_limit_bytes=vmem_limit,
        ),
        cost_estimate=pl.CostEstimate(
            flops=2 * total,
            transcendentals=0,
            bytes_accessed=total * (in_item + out_item),
        ),
    )(x2d)

    return out2d.reshape(x.shape)


if __name__ == "__main__":
    key = jax.random.PRNGKey(0)
    in_range = (0.0, 1.0)
    out_range = (-1.0, 1.0)
    ref_scale = (out_range[1] - out_range[0]) / (in_range[1] - in_range[0])
    ref_bias = out_range[0] - ref_scale * in_range[0]

    k1, k2, k3 = jax.random.split(key, 3)

    # 1) NCHW input: batch=2, channels=4, spatial=16x16.  Force the Pallas
    #    path (min_pallas_bytes=0) so the kernel itself is exercised.
    x1 = jax.random.uniform(k1, (2, 4, 16, 16), dtype=jnp.float32)
    out1 = jax.block_until_ready(
        rescale_pallas(x1, in_range, out_range, min_pallas_bytes=0))
    ref1 = ref_scale * x1 + ref_bias
    assert out1.shape == x1.shape and out1.dtype == x1.dtype
    assert jnp.allclose(out1, ref1, atol=1e-6, rtol=1e-6)

    # Default dispatch (small input -> fused XLA path) must agree too.
    out1_small = jax.block_until_ready(rescale_pallas(x1, in_range, out_range))
    assert jnp.allclose(out1_small, ref1, atol=1e-6, rtol=1e-6)

    # 2) Non-lane-aligned element count: zero-copy ragged path (masked
    #    boundary blocks, no pad / slice passes).
    x2 = jax.random.uniform(k2, (2, 3, 5, 7), dtype=jnp.float32)
    out2 = jax.block_until_ready(
        rescale_pallas(x2, in_range, out_range, min_pallas_bytes=0))
    ref2 = ref_scale * x2 + ref_bias
    assert out2.shape == x2.shape and out2.dtype == x2.dtype
    assert jnp.allclose(out2, ref2, atol=1e-6, rtol=1e-6)

    # 3) bf16 input: computed in f32 in-register, single rounding on store.
    x3 = jax.random.uniform(k3, (2, 4, 16, 16), dtype=jnp.float32).astype(jnp.bfloat16)
    out3 = jax.block_until_ready(
        rescale_pallas(x3, in_range, out_range, min_pallas_bytes=0))
    ref3 = (x3.astype(jnp.float32) * ref_scale + ref_bias).astype(jnp.bfloat16)
    assert out3.shape == x3.shape and out3.dtype == jnp.bfloat16
    assert jnp.allclose(out3.astype(jnp.float32), ref3.astype(jnp.float32),
                        atol=1e-2, rtol=1e-2)

    print("KERNEL_OK")
</pallas_src>

<mosaic_0001>
module attributes {stable_mosaic.version = 11 : i64} {
  func.func @_rescale_kernel(%arg0: i32, %arg1: i32, %arg2: memref<8x128xf32, #tpu.memory_space<vmem>>, %arg3: memref<8x128xf32, #tpu.memory_space<vmem>>) attributes {dimension_semantics = [#tpu.dimension_semantics<parallel>, #tpu.dimension_semantics<parallel>], iteration_bounds = array<i64: 2, 1>, scalar_prefetch = 0 : i64, scratch_operands = 0 : i64, tpu.core_type = #tpu.core_type<tc>, window_params = [{transform_indices = @transform_0, window_bounds = array<i64: 8, 128>}, {transform_indices = @transform_1, window_bounds = array<i64: 8, 128>}]} {
    %c0 = arith.constant 0 : index
    %c0_0 = arith.constant 0 : index
    %0 = vector.load %arg2[%c0, %c0_0] : memref<8x128xf32, #tpu.memory_space<vmem>>, vector<8x128xf32>
    %cst = arith.constant 2.000000e+00 : f32
    %1 = vector.broadcast %cst : f32 to vector<8x128xf32>
    %2 = arith.mulf %0, %1 : vector<8x128xf32>
    %cst_1 = arith.constant -1.000000e+00 : f32
    %3 = vector.broadcast %cst_1 : f32 to vector<8x128xf32>
    %4 = arith.addf %2, %3 : vector<8x128xf32>
    %c0_2 = arith.constant 0 : index
    %c0_3 = arith.constant 0 : index
    %5 = vector.load %arg3[%c0_2, %c0_3] : memref<8x128xf32, #tpu.memory_space<vmem>>, vector<8x128xf32>
    tpu.vector_store %arg3[%c0_2, %c0_3], %4 {strides = array<i32>} : memref<8x128xf32, #tpu.memory_space<vmem>>, vector<8x128xf32>,
    return
  }
  func.func @transform_0(%arg0: i32, %arg1: i32) -> (i32, i32) {
    %c0_i32 = arith.constant 0 : i32
    return %arg0, %arg1 : i32, i32
  }
  func.func @transform_1(%arg0: i32, %arg1: i32) -> (i32, i32) {
    %c0_i32 = arith.constant 0 : i32
    return %arg0, %arg1 : i32, i32
  }
}

</mosaic_0001>

<bundles_post_ra>
// kernel: tpu_custom_call.1
= control target key start
LH: loop header
LB: loop body
LE: loop exit
PB: predicated region body
PF: predicated region fallthrough
CT: control target
= control target key end

     0   :  { %6 = vsyncpa [#allocation3], 0  ;;  %s579_s0 = inlined_call_operand.hbm [shape: f32[16,128], index: 0, kind: input, shape index: {}]   ;;  %s580_s1 = inlined_call_operand.hbm [shape: f32[16,128], index: 1, kind: output, shape index: {}]  }
   0x1   :  { %8 = vsyncpa [#allocation3 + $0x1], 0 }
   0x2   :  { %9 = vsyncpa [#allocation4], 0 }
   0x3   :  { %11 = vsyncpa [#allocation4 + $0x1], 0  ;;  %s445_s6 = smov 0   ;;  %s447_s7 = smov 0  }
   0x4   :  { %s449_s8 = smov 0   ;;  %s451_s9 = smov 0  }
   0x5   :  { %s453_s10 = smov 0   ;;  %s455_s11 = smov 0  }
   0x6 LB: > { %s248_s12 = sadd.s32 4294967295, %s431_s11   ;;  %s249_s13 = sadd.s32 4294967294, %s431_s11   ;;  %s431_s11 = sphi %s455_s11, %s17_s11   ;;  %s427_s10 = sphi %s453_s10, %s592_s10   ;;  %s423_s9 = sphi %s451_s9, %s591_s9   ;;  %s419_s8 = sphi %s449_s8, %s590_s8   ;;  %s415_s7 = sphi %s447_s7, %s589_s7   ;;  %s411_s6 = sphi %s445_s6, %s588_s6  }
   0x7   : > { %s29_s14 = sadd.s32 1, %s427_s10  ;;  %s38_s15 = sadd.s32 1, %s419_s8 }
   0x8   : > { %p31_p0 = scmp.ge.s32.totalorder %s29_s14, 2  ;;  %p45_p1 = scmp.ne.s32.totalorder %s419_s8, %s415_s7 }
   0x9   : > { %p46_p2 = scmp.eq.s32.totalorder %s431_s11, 0  ;;  %p51_p3 = scmp.ne.s32.totalorder %s415_s7, %s411_s6 }
   0xa   : > { %s594_s14 = smov (%p31_p0, %s29_s14), 0  ;;  %p52_p5 = scmp.eq.s32.totalorder %s248_s12, 0 }
   0xb   : > { %p486_p4 = por %p46_p2, %p45_p1  ;;  %s33_s17 = ssub.s32 %s427_s10, %s594_s14 }
   0xc   : > { %p77_p6 = scmp.eq.s32.totalorder %s248_s12, 1  ;;  %p36_p7 = scmp.eq.s32.totalorder %s33_s17, 0 }
   0xd   : > { %p492_p8 = por %p52_p5, %p51_p3  ;;  %p83_p10 = scmp.eq.s32.totalorder %s249_s13, 1 }
   0xe   : > { %p496_p9 = por %p77_p6, %p45_p1  ;;  %p273_p13 = scmp.lt.s32.totalorder %s431_s11, 2 }
   0xf   : > { %s501_s20 = scalar_select %p36_p7, %s419_s8, %s38_s15  }
  0x10   : > { %p503_p11 = por %p83_p10, %p51_p3  ;;  %s103_s22 = sand.u32 1, %s419_s8  }
  0x11   : > { %s252_s23 = sshll.u32 %s103_s22, 3  ;;  %s253_s24 = sshll.u32 %s427_s10, 7 }
  0x12   : > { %s584_s21 = scalar_select %p503_p11, 1, 0 }
  0x13   : > { %s113_s27 = scalar_lea.hbm %s579_s0, %s253_s24  ;;  %s107_s28 = scalar_lea.vmem [#allocation2], %s252_s23 }
  0x14   : > { %s115_s29 = sshll.u32 %s107_s28, 4  ;;  %p516_p0 = pnand %p273_p13, %p486_p4  ;;  %s116_s29 = int_to_ptr.vmem [resolvable:$true] %s115_s29 }
  0x15   : > { %p254_p1 = scmp.ge.s32.totalorder %s431_s11, 1  ;;  %p120_p2 = scmp.lt.s32.totalorder %s431_s11, 3 }
  0x16   : > { %s104_s2 = scalar_lea.sflag [#allocation3], %s103_s22  ;;  %p325_p3 = pneg %p516_p0 }
  0x17   : > { %s336_s3 = scalar_lea.vmem %s116_s29, 128  ;;  %s433_s4 = smov [#allocation2]  }
  0x18   : > { %p337_p5 = scmp.ne.s32.totalorder %s116_s29, %s336_s3  ;;  %s341_s5 = sshll.u32 %s433_s4, 4  ;;  %s342_s5 = int_to_ptr.vmem [resolvable:$false] %s341_s5 }
  0x19   : > { %s343_s12 = scalar_lea.vmem %s342_s5, 256  ;;  %p344_p10 = scmp.lt.s32.totalorder %s116_s29, %s342_s5 }
  0x1a   : > { %p339_p6 = pnand %p337_p5, %p325_p3  ;;  %p345_p12 = scmp.lt.s32.totalorder %s343_s12, %s336_s3 }
  0x1c   : > { %p340_p7 = pneg %p339_p6  ;;  %p346_p4 = por %p345_p12, %p344_p10 }
  0x1e   : > { %p347_p13 = pnand %p346_p4, %p340_p7 }
  0x20   : > { %350 = shalt.err (!%p347_p13)
}
  0x21   : > { %268 = dma.hbm_to_vmem [thread:$0]  (!%p516_p0), %s113_s27, 128, %s116_s29, %s104_s2  }
  0x22   : > { %p121_p11 = pnand %p254_p1, %p120_p2 }
  0x23   : > { %s531_s13 = sand.u32 (!%p121_p11), 1, %s415_s7  }
  0x24   : > { %124 = sbr.rel (%p121_p11) target bundleno = 66 (0x42), region = 24  ;;  %s255_s15 = sshll.u32 (!%p121_p11), %s531_s13, 3 }
  0x25   : > { %s127_s16 = scalar_lea.sflag (!%p121_p11), [#allocation3], %s531_s13  ;;  %s130_s17 = scalar_lea.vmem (!%p121_p11), [#allocation2], %s255_s15 }
  0x29   : > { %402 = dma.done.wait (%p492_p8), %s127_s16, 128  }
  0x2a   : > { %404 = vsyncadd (%p492_p8), %s127_s16, 4294967168  ;;  %v149_v0 = vld [vmem:[%s130_s17] sm:$0xff]  ;;  %s148_s22 = scalar_lea.vmem [#allocation5], %s255_s15  ;;  %s258_s24 = sshll.u32 %s423_s9, 7 }
  0x2b   : > { %s168_s23 = sshll.u32 %s148_s22, 4  ;;  %v150_v1 = vmul.f32 2.0, %v149_v0  ;;  %s166_s27 = scalar_lea.hbm %s580_s1, %s258_s24  ;;  %s169_s23 = int_to_ptr.vmem [resolvable:$true] %s168_s23 }
  0x2c   : > { %s154_s28 = scalar_lea.sflag [#allocation4], %s531_s13  ;;  %s351_s29 = scalar_lea.vmem %s169_s23, 128 }
  0x2d   : > { %v151_v2 = vadd.f32 -1.0, %v150_v1  ;;  %p352_p11 = scmp.ne.s32.totalorder %s169_s23, %s351_s29  ;;  %s434_s18 = smov [#allocation5]  }
  0x2e   : > { %s355_s30 = sshll.u32 %s434_s18, 4  ;;  %s356_s30 = int_to_ptr.vmem [resolvable:$false] %s355_s30 }
  0x2f   : > { %152 = vst [vmem:[%s148_s22] sm:$0xff] %v151_v2  ;;  %p353_p8 = pnand %p352_p11, %p496_p9  ;;  %s357_s2 = scalar_lea.vmem %s356_s30, 256 }
  0x30   : > { %p358_p0 = scmp.lt.s32.totalorder %s169_s23, %s356_s30  ;;  %p359_p1 = scmp.lt.s32.totalorder %s357_s2, %s351_s29 }
  0x31   : > { %p354_p12 = pneg %p353_p8 }
  0x32   : > { %p360_p2 = por %p359_p1, %p358_p0 }
  0x34   : > { %p361_p3 = pnand %p360_p2, %p354_p12 }
  0x36   : > { %364 = shalt.err (!%p361_p3)
}
  0x37   : > { %s365_s9 = scalar_lea.hbm %s166_s27, 128  ;;  %s369_s5 = scalar_lea.hbm %s580_s1, 256 }
  0x38   : > { %p366_p5 = scmp.ne.s32.totalorder %s166_s27, %s365_s9  ;;  %p370_p10 = scmp.lt.s32.totalorder %s166_s27, %s580_s1 }
  0x39   : > { %p371_p4 = scmp.lt.s32.totalorder %s369_s5, %s365_s9 }
  0x3a   : > { %p367_p6 = pnand %p366_p5, %p496_p9 }
  0x3b   : > { %p372_p13 = por %p371_p4, %p370_p10 }
  0x3c   : > { %p368_p7 = pneg %p367_p6 }
  0x3e   : > { %p373_p11 = pnand %p372_p13, %p368_p7 }
  0x40   : > { %376 = shalt.err (!%p373_p11)
}
  0x41   : > { %263 = dma.vmem_to_hbm [thread:$0]  (%p496_p9), %s169_s23, 128, %s166_s27, %s154_s28  }
  0x42 PF: > { %s180_s15 = sand.u32 1, %s411_s6   ;;  %p586_p8 = scmp.ne.s32.totalorder %s584_s21, 0 }
  0x43   : > { %p587_p12 = scmp.ge.s32.totalorder %s431_s11, 2  ;;  %s181_s16 = scalar_lea.sflag [#allocation4], %s180_s15 }
  0x45   : > { %p270_p0 = pnand %p587_p12, %p586_p8 }
  0x47   : > { %p271_p1 = pneg %p270_p0 }
  0x49   : > { %406 = dma.done.wait (%p271_p1), %s181_s16, 128  }
  0x4a   : > { %408 = vsyncadd (%p271_p1), %s181_s16, 4294967168  ;;  %s17_s11 = sadd.s32 1, %s431_s11   ;;  %s588_s6 = smov %s415_s7 }
  0x4b   : > { %p14_p2 = scmp.ge.s32.totalorder %s17_s11, 4   ;;  %s589_s7 = smov %s419_s8 }
  0x4c   : > { %s590_s8 = smov %s501_s20  ;;  %s591_s9 = smov %s427_s10 }
  0x4d   : > { %s592_s10 = smov %s594_s14  ;;  %16 = sbr.rel (!%p14_p2) target bundleno = 6 (0x6), region = 69 }
  0x52   :  { %186 = vsyncpa [#allocation3], 1 }
  0x53   :  { %188 = vsyncpa [#allocation3 + $0x1], 1 }
  0x54   :  { %189 = vsyncpa [#allocation4], 1 }
  0x55   :  { %191 = vsyncpa [#allocation4 + $0x1], 1 }

</bundles_post_ra>
